<compile_context>
chip_gen: v7x
topology: tpu7x:2x2x1
jax: 0.10.0
libtpu: 0.0.40
codegen_flags: <defaults>
</compile_context>

<pallas_src>
import jax
import jax.numpy as jnp
from jax.experimental import pallas as pl
from jax.experimental.pallas import tpu as pltpu

C_IN = 3
C_MID = 13
C_OUT = 13


def _round_up(x, m):
    return -(-x // m) * m


def _cdiv(a, b):
    return -(-a // b)


def _largest_divisor_le(n, cap):
    cap = max(1, min(n, cap))
    for d in range(cap, 0, -1):
        if n % d == 0:
            return d
    return 1


def _fused_conv1x1_relu_kernel(x_ref, w_ref, b_ref, o_ref):
    # x_ref: (n_blk, C_IN, t)   flattened pixels on the 128-lane axis
    # w_ref: (C_OUT, C_IN)      fused weight  (w2 @ w1)
    # b_ref: (C_OUT, 1)         fused bias    (w2 @ b1 + b2)
    # o_ref: (n_blk, C_OUT, t)
    x = x_ref[...]
    w = w_ref[...]
    # Unrolled VPU broadcast multiply-accumulate over the K=3 input channels.
    y = w[None, :, 0:1] * x[:, 0:1, :]                 # (n_blk, C_OUT, t)
    for c in range(1, C_IN):                           # static unroll
        y = y + w[None, :, c:c + 1] * x[:, c:c + 1, :]
    y = y + b_ref[...][None, :, :]
    o_ref[...] = jnp.maximum(y, 0.0).astype(o_ref.dtype)


def _plan_tiles(n, hw, t_hw):
    """Pick (n_blk, t, hw_pad): spatial tile t (multiple of 128), samples per
    grid step n_blk (divides n), padded spatial extent hw_pad (mult. of 128)."""
    hw_pad = _round_up(hw, 128)
    t = min(_round_up(t_hw, 128), hw_pad)

    # v7x has 2 TensorCores fed by sharding "parallel" grid axes: aim for >= ~8
    # grid steps so both cores get work and the DMA pipeline primes, but never
    # shrink below 2048 px (~128 KB of traffic per step) which would expose the
    # ~0.35 us fixed per-step overhead.
    TARGET_STEPS = 8
    MIN_T = 2048
    while n * _cdiv(hw_pad, t) < TARGET_STEPS and t > MIN_T:
        t = _round_up(max(MIN_T, t // 2), 128)

    # Small-image path: one sample's spatial extent is far below the target
    # tile -> batch several samples per grid step so each step still moves a
    # long contiguous run.
    n_blk = 1
    if n > 1 and t == hw_pad and 2 * hw_pad <= t_hw:
        n_blk = _largest_divisor_le(n, t_hw // hw_pad)
    return n_blk, t, hw_pad


def conv1x1_conv1x1_relu(x_nchw, w1, b1, w2, b2, *, t_hw=32768):
    """Fused conv1(1x1) -> conv2(1x1) -> relu.  x_nchw: (N, 3, H, W) f32."""
    n, c, h, w = x_nchw.shape
    assert c == C_IN
    hw = h * w

    # Fuse the two 1x1 convolutions (both linear; relu only after conv2).
    w_fused = w2 @ w1                               # (C_OUT, C_IN)
    b_fused = (w2 @ b1 + b2).reshape(C_OUT, 1)      # (C_OUT, 1)

    # Channel-major, zero-copy: NCHW -> (N, C, H*W) is a pure view.
    x3 = x_nchw.reshape(n, C_IN, hw)

    n_blk, t, hw_pad = _plan_tiles(n, hw, t_hw)
    if hw_pad != hw:
        # Lane-dense (unmasked) stores need a 128-multiple spatial extent; the
        # pad is <= 127 pixels and is sliced back off below.
        x3 = jnp.pad(x3, ((0, 0), (0, 0), (0, hw_pad - hw)))
    grid = (n // n_blk, _cdiv(hw_pad, t))

    # Per-step VMEM: input pads 3 -> 8 sublanes, output 13 -> 16 sublanes;
    # x2 for double buffering plus headroom.
    step_bytes = n_blk * t * 4 * (_round_up(C_IN, 8) + _round_up(C_OUT, 8))
    vmem_limit = int(min(48 * 2**20, max(16 * 2**20, 4 * step_bytes)))

    out3 = pl.pallas_call(
        _fused_conv1x1_relu_kernel,
        out_shape=jax.ShapeDtypeStruct((n, C_OUT, hw_pad), jnp.float32),
        grid=grid,
        in_specs=[
            pl.BlockSpec((n_blk, C_IN, t), lambda ni, ji: (ni, 0, ji)),
            pl.BlockSpec((C_OUT, C_IN), lambda ni, ji: (0, 0)),
            pl.BlockSpec((C_OUT, 1), lambda ni, ji: (0, 0)),
        ],
        out_specs=pl.BlockSpec((n_blk, C_OUT, t), lambda ni, ji: (ni, 0, ji)),
        compiler_params=pltpu.CompilerParams(
            dimension_semantics=("parallel", "parallel"),
            vmem_limit_bytes=vmem_limit),
        cost_estimate=pl.CostEstimate(
            flops=(2 * C_OUT * C_IN + 2 * C_OUT) * n * hw,
            transcendentals=0,
            bytes_accessed=4 * (C_IN + C_OUT) * n * hw),
    )(x3, w_fused, b_fused)

    if hw_pad != hw:
        out3 = out3[:, :, :hw]
    # (N, C_OUT, H*W) -> NCHW: pure view, no data movement.
    return out3.reshape(n, C_OUT, h, w)


def _reference(x_nchw, w1, b1, w2, b2):
    # Pure-JAX, unfused reference (1x1 convs == per-pixel channel matmuls).
    h1 = jnp.einsum("nchw,mc->nmhw", x_nchw, w1) + b1[None, :, None, None]
    y = jnp.einsum("nchw,mc->nmhw", h1, w2) + b2[None, :, None, None]
    return jnp.maximum(y, 0.0)


if __name__ == "__main__":
    key = jax.random.PRNGKey(0)
    k_x, k_w1, k_b1, k_w2, k_b2 = jax.random.split(key, 5)

    # Small shapes consistent with the module's forward (NCHW, 3 input channels).
    N, H, W = 2, 32, 32
    x = jax.random.normal(k_x, (N, C_IN, H, W), dtype=jnp.float32)

    # Deterministic parameter init (uniform ~ PyTorch Conv2d default scale).
    bound1 = 1.0 / (C_IN ** 0.5)
    w1 = jax.random.uniform(k_w1, (C_MID, C_IN), jnp.float32, -bound1, bound1)
    b1 = jax.random.uniform(k_b1, (C_MID,), jnp.float32, -bound1, bound1)
    bound2 = 1.0 / (C_MID ** 0.5)
    w2 = jax.random.uniform(k_w2, (C_OUT, C_MID), jnp.float32, -bound2, bound2)
    b2 = jax.random.uniform(k_b2, (C_OUT,), jnp.float32, -bound2, bound2)

    out = jax.block_until_ready(conv1x1_conv1x1_relu(x, w1, b1, w2, b2))
    ref = _reference(x, w1, b1, w2, b2)
    assert out.shape == (N, C_OUT, H, W)
    assert jnp.allclose(out, ref, atol=2e-5, rtol=2e-5)

    # Ragged-spatial path (H*W not a multiple of 128): exercises the pad+slice
    # fix that replaced the old full-extent fallback.
    x_r = jax.random.normal(k_x, (N, C_IN, 30, 30), dtype=jnp.float32)
    out_r = jax.block_until_ready(conv1x1_conv1x1_relu(x_r, w1, b1, w2, b2))
    ref_r = _reference(x_r, w1, b1, w2, b2)
    assert out_r.shape == (N, C_OUT, 30, 30)
    assert jnp.allclose(out_r, ref_r, atol=2e-5, rtol=2e-5)

    print("KERNEL_OK")
</pallas_src>

<mosaic_0001>
module attributes {stable_mosaic.version = 11 : i64} {
  func.func @_fused_conv1x1_relu_kernel(%arg0: i32, %arg1: i32, %arg2: memref<2x3x1024xf32, #tpu.memory_space<vmem>>, %arg3: memref<13x3xf32, #tpu.memory_space<vmem>>, %arg4: memref<13x1xf32, #tpu.memory_space<vmem>>, %arg5: memref<2x13x1024xf32, #tpu.memory_space<vmem>>) attributes {dimension_semantics = [#tpu.dimension_semantics<parallel>, #tpu.dimension_semantics<parallel>], iteration_bounds = array<i64: 1, 1>, scalar_prefetch = 0 : i64, scratch_operands = 0 : i64, tpu.core_type = #tpu.core_type<tc>, window_params = [{transform_indices = @transform_0, window_bounds = array<i64: 2, 3, 1024>}, {pipeline_mode = #tpu.pipeline_mode<synchronous>, transform_indices = @transform_1, window_bounds = array<i64: 13, 3>}, {pipeline_mode = #tpu.pipeline_mode<synchronous>, transform_indices = @transform_2, window_bounds = array<i64: 13, 1>}, {transform_indices = @transform_3, window_bounds = array<i64: 2, 13, 1024>}]} {
    %c0 = arith.constant 0 : index
    %c0_0 = arith.constant 0 : index
    %c0_1 = arith.constant 0 : index
    %0 = vector.load %arg2[%c0, %c0_0, %c0_1] : memref<2x3x1024xf32, #tpu.memory_space<vmem>>, vector<2x3x1024xf32>
    %c0_2 = arith.constant 0 : index
    %c0_3 = arith.constant 0 : index
    %1 = vector.load %arg3[%c0_2, %c0_3] : memref<13x3xf32, #tpu.memory_space<vmem>>, vector<13x3xf32>
    %2 = vector.extract_strided_slice %1 {offsets = [0, 0], sizes = [13, 1], strides = [1, 1]} : vector<13x3xf32> to vector<13x1xf32>
    %3 = vector.shape_cast %2 : vector<13x1xf32> to vector<1x13x1xf32>
    %4 = vector.extract_strided_slice %0 {offsets = [0, 0, 0], sizes = [2, 1, 1024], strides = [1, 1, 1]} : vector<2x3x1024xf32> to vector<2x1x1024xf32>
    %5 = vector.broadcast %3 : vector<1x13x1xf32> to vector<2x13x1024xf32>
    %6 = vector.broadcast %4 : vector<2x1x1024xf32> to vector<2x13x1024xf32>
    %7 = arith.mulf %5, %6 : vector<2x13x1024xf32>
    %8 = vector.extract_strided_slice %1 {offsets = [0, 1], sizes = [13, 1], strides = [1, 1]} : vector<13x3xf32> to vector<13x1xf32>
    %9 = vector.shape_cast %8 : vector<13x1xf32> to vector<1x13x1xf32>
    %10 = vector.extract_strided_slice %0 {offsets = [0, 1, 0], sizes = [2, 1, 1024], strides = [1, 1, 1]} : vector<2x3x1024xf32> to vector<2x1x1024xf32>
    %11 = vector.broadcast %9 : vector<1x13x1xf32> to vector<2x13x1024xf32>
    %12 = vector.broadcast %10 : vector<2x1x1024xf32> to vector<2x13x1024xf32>
    %13 = arith.mulf %11, %12 : vector<2x13x1024xf32>
    %14 = arith.addf %7, %13 : vector<2x13x1024xf32>
    %15 = vector.extract_strided_slice %1 {offsets = [0, 2], sizes = [13, 1], strides = [1, 1]} : vector<13x3xf32> to vector<13x1xf32>
    %16 = vector.shape_cast %15 : vector<13x1xf32> to vector<1x13x1xf32>
    %17 = vector.extract_strided_slice %0 {offsets = [0, 2, 0], sizes = [2, 1, 1024], strides = [1, 1, 1]} : vector<2x3x1024xf32> to vector<2x1x1024xf32>
    %18 = vector.broadcast %16 : vector<1x13x1xf32> to vector<2x13x1024xf32>
    %19 = vector.broadcast %17 : vector<2x1x1024xf32> to vector<2x13x1024xf32>
    %20 = arith.mulf %18, %19 : vector<2x13x1024xf32>
    %21 = arith.addf %14, %20 : vector<2x13x1024xf32>
    %c0_4 = arith.constant 0 : index
    %c0_5 = arith.constant 0 : index
    %22 = vector.load %arg4[%c0_4, %c0_5] : memref<13x1xf32, #tpu.memory_space<vmem>>, vector<13x1xf32>
    %23 = vector.shape_cast %22 : vector<13x1xf32> to vector<1x13x1xf32>
    %24 = vector.broadcast %23 : vector<1x13x1xf32> to vector<2x13x1024xf32>
    %25 = arith.addf %21, %24 : vector<2x13x1024xf32>
    %cst = arith.constant 0.000000e+00 : f32
    %26 = vector.broadcast %cst : f32 to vector<2x13x1024xf32>
    %27 = arith.maximumf %25, %26 : vector<2x13x1024xf32>
    %c0_6 = arith.constant 0 : index
    %c0_7 = arith.constant 0 : index
    %c0_8 = arith.constant 0 : index
    %28 = vector.load %arg5[%c0_6, %c0_7, %c0_8] : memref<2x13x1024xf32, #tpu.memory_space<vmem>>, vector<2x13x1024xf32>
    tpu.vector_store %arg5[%c0_6, %c0_7, %c0_8], %27 {strides = array<i32>} : memref<2x13x1024xf32, #tpu.memory_space<vmem>>, vector<2x13x1024xf32>,
    return
  }
  func.func @transform_0(%arg0: i32, %arg1: i32) -> (i32, i32, i32) {
    %c0_i32 = arith.constant 0 : i32
    %c0_i32_0 = arith.constant 0 : i32
    return %arg0, %c0_i32, %arg1 : i32, i32, i32
  }
  func.func @transform_1(%arg0: i32, %arg1: i32) -> (i32, i32) {
    %c0_i32 = arith.constant 0 : i32
    %c0_i32_0 = arith.constant 0 : i32
    %c0_i32_1 = arith.constant 0 : i32
    return %c0_i32, %c0_i32_0 : i32, i32
  }
  func.func @transform_2(%arg0: i32, %arg1: i32) -> (i32, i32) {
    %c0_i32 = arith.constant 0 : i32
    %c0_i32_0 = arith.constant 0 : i32
    %c0_i32_1 = arith.constant 0 : i32
    return %c0_i32, %c0_i32_0 : i32, i32
  }
  func.func @transform_3(%arg0: i32, %arg1: i32) -> (i32, i32, i32) {
    %c0_i32 = arith.constant 0 : i32
    %c0_i32_0 = arith.constant 0 : i32
    return %arg0, %c0_i32, %arg1 : i32, i32, i32
  }
}

</mosaic_0001>

<bundles_post_ra>
// kernel: tpu_custom_call.1
= control target key start
LH: loop header
LB: loop body
LE: loop exit
PB: predicated region body
PF: predicated region fallthrough
CT: control target
= control target key end

     0   :  { %v771_v0 = vmov 1   ;;  %v772_v1 = vmov 0   ;;  %v773_v4 = vmov 2   ;;  %v42_v7 = vlaneseq  ;;  %s1308_s1 = inlined_call_operand.vmem [shape: f32[13,3], index: 1, kind: input, shape index: {}]   ;;  %s1309_s2 = inlined_call_operand.vmem [shape: f32[13,1], index: 2, kind: input, shape index: {}]   ;;  %s1310_s0 = inlined_call_operand.vmem [shape: f32[2,3,1024], index: 0, kind: input, shape index: {}]   ;;  %s1311_s3 = inlined_call_operand.vmem [shape: f32[2,13,1024], index: 3, kind: output, shape index: {}]  }
   0x1   :  { %766 = vset.pattern.permute.xlu1 %v771_v0  ;;  %765 = vset.pattern.permute.xlu0 %v772_v1  ;;  %v22_v2 = vld [vmem:[%s1308_s1] sm:$0xff]  ;;  %v23_v3 = vld [vmem:[%s1308_s1 + $0x8] sm:$0x1f]  ;;  %v823_v15 = vld [vmem:[%s1310_s0 + $0x10] sm:$0x77] }
   0x2   :  { %219 = vperm.xlu1 %766, %v22_v2   ;;  %26 = vperm.xlu0 %765, %v22_v2   ;;  %v650_v5 = vld [vmem:[%s1309_s2] sm:$0xff]  ;;  %v651_v6 = vld [vmem:[%s1309_s2 + $0x8] sm:$0x1f]  ;;  %v43_v8 = vshrl.u32 %v42_v7, 7  ;;  %v828_v16 = vld [vmem:[%s1310_s0 + $0x18] sm:$0x77] }
   0x3   :  { %v809_v11 = vld [vmem:[%s1310_s0] sm:$0x77]  ;;  %v814_v12 = vld [vmem:[%s1310_s0 + $0x8] sm:$0x77]  ;;  %v847_v21 = vld [vmem:[%s1310_s0 + $0x30] sm:$0x77] }
   0x4   :  { %v44_v9 = vsub.s32 0, %v43_v8  ;;  %v48_v10 = vsub.s32 4, %v43_v8  ;;  %v816_v13 = vsub.s32 1, %v43_v8  ;;  %v818_v14 = vsub.s32 5, %v43_v8  ;;  %v837_v19 = vld [vmem:[%s1310_s0 + $0x20] sm:$0x77] }
   0x5   :  { %v830_v17 = vsub.s32 2, %v43_v8  ;;  %v832_v18 = vsub.s32 6, %v43_v8  ;;  %v842_v20 = vld [vmem:[%s1310_s0 + $0x28] sm:$0x77]  ;;  %v852_v22 = vld [vmem:[%s1310_s0 + $0x38] sm:$0x77] }
   0x6   :  { %223 = vperm.xlu1 %766, %v23_v3   ;;  %31 = vperm.xlu0 %765, %v23_v3   ;;  %v45_v23 = vrot.slane %v809_v11, %v44_v9  ;;  %v49_v24 = vrot.slane %v809_v11, %v48_v10  ;;  %v53_v25 = vrot.slane %v814_v12, %v44_v9 }
   0x7   :  { %v57_v26 = vrot.slane %v814_v12, %v48_v10  ;;  %v61_v27 = vrot.slane %v823_v15, %v44_v9  ;;  %v65_v28 = vrot.slane %v823_v15, %v48_v10  ;;  %v69_v29 = vrot.slane %v828_v16, %v44_v9 }
   0x8   :  { %v73_v30 = vrot.slane %v828_v16, %v48_v10  ;;  %v77_v31 = vrot.slane %v837_v19, %v44_v9  ;;  %v81_v32 = vrot.slane %v837_v19, %v48_v10  ;;  %v85_v33 = vrot.slane %v842_v20, %v44_v9 }
   0x9   :  { %v89_v34 = vrot.slane %v842_v20, %v48_v10  ;;  %v93_v35 = vrot.slane %v847_v21, %v44_v9  ;;  %v97_v36 = vrot.slane %v847_v21, %v48_v10  ;;  %v101_v37 = vrot.slane %v852_v22, %v44_v9 }
   0xa   :  { %768 = vset.pattern.permute.xlu1 %v773_v4  ;;  %767 = vset.pattern.permute.xlu0 %v773_v4  ;;  %v105_v38 = vrot.slane %v852_v22, %v48_v10  ;;  %v870_v39 = vrot.slane %v45_v23, %v44_v9  ;;  %v872_v40 = vrot.slane %v49_v24, %v44_v9 }
   0xb   :  { %439 = vperm.xlu1 %768, %v23_v3   ;;  %435 = vperm.xlu0 %767, %v22_v2   ;;  %v874_v41 = vrot.slane %v53_v25, %v44_v9  ;;  %v876_v42 = vrot.slane %v57_v26, %v44_v9  ;;  %v878_v43 = vrot.slane %v61_v27, %v44_v9 }
   0xc   :  { %1352 = vst [vmem:[#allocation2_spill] sm:$0xff] %v870_v39  ;;  %1353 = vst [vmem:[#allocation3_spill] sm:$0xff] %v872_v40  ;;  %v880_v44 = vrot.slane %v65_v28, %v44_v9  ;;  %v882_v45 = vrot.slane %v69_v29, %v44_v9  ;;  %v884_v46 = vrot.slane %v73_v30, %v44_v9 }
   0xd   :  { %1354 = vst [vmem:[#allocation4_spill] sm:$0xff] %v874_v41  ;;  %1355 = vst [vmem:[#allocation5_spill] sm:$0xff] %v876_v42  ;;  %v886_v47 = vrot.slane %v77_v31, %v44_v9  ;;  %v888_v48 = vrot.slane %v81_v32, %v44_v9  ;;  %v890_v49 = vrot.slane %v85_v33, %v44_v9 }
   0xe   :  { %1356 = vst [vmem:[#allocation6_spill] sm:$0xff] %v878_v43  ;;  %1357 = vst [vmem:[#allocation7_spill] sm:$0xff] %v880_v44  ;;  %v892_v50 = vrot.slane %v89_v34, %v44_v9  ;;  %v894_v51 = vrot.slane %v93_v35, %v44_v9  ;;  %v896_v52 = vrot.slane %v97_v36, %v44_v9 }
   0xf   :  { %769 = vset.pattern.permute.xlu1 %v772_v1  ;;  %770 = vset.pattern.permute.xlu0 %v772_v1  ;;  %1358 = vst [vmem:[#allocation8_spill] sm:$0xff] %v882_v45  ;;  %1359 = vst [vmem:[#allocation9_spill] sm:$0xff] %v884_v46  ;;  %v898_v53 = vrot.slane %v101_v37, %v44_v9  ;;  %v900_v54 = vrot.slane %v105_v38, %v44_v9 }
  0x10   :  { %654 = vperm.xlu1 %769, %v650_v5   ;;  %659 = vperm.xlu0 %770, %v651_v6   ;;  %1360 = vst [vmem:[#allocation10_spill] sm:$0xff] %v886_v47  ;;  %1361 = vst [vmem:[#allocation11_spill] sm:$0xff] %v888_v48  ;;  %v229_v55 = vrot.slane %v809_v11, %v816_v13  ;;  %v233_v56 = vrot.slane %v809_v11, %v818_v14 }
  0x11   :  { %1362 = vst [vmem:[#allocation12_spill] sm:$0xff] %v890_v49  ;;  %1363 = vst [vmem:[#allocation13_spill] sm:$0xff] %v892_v50  ;;  %v237_v57 = vrot.slane %v814_v12, %v816_v13  ;;  %v241_v58 = vrot.slane %v814_v12, %v818_v14  ;;  %v245_v59 = vrot.slane %v823_v15, %v816_v13 }
  0x12   :  { %1364 = vst [vmem:[#allocation14_spill] sm:$0xff] %v894_v51  ;;  %1365 = vst [vmem:[#allocation15_spill] sm:$0xff] %v896_v52  ;;  %v249_v60 = vrot.slane %v823_v15, %v818_v14  ;;  %v253_v61 = vrot.slane %v828_v16, %v816_v13  ;;  %v257_v62 = vrot.slane %v828_v16, %v818_v14 }
  0x13   :  { %1366 = vst [vmem:[#allocation16_spill] sm:$0xff] %v898_v53  ;;  %1367 = vst [vmem:[#allocation17_spill] sm:$0xff] %v900_v54  ;;  %v261_v63 = vrot.slane %v837_v19, %v816_v13  ;;  %v265_v0 = vrot.slane %v837_v19, %v818_v14  ;;  %v269_v1 = vrot.slane %v842_v20, %v816_v13 }
  0x14   :  { %v273_v2 = vrot.slane %v842_v20, %v818_v14  ;;  %v277_v3 = vrot.slane %v847_v21, %v816_v13  ;;  %v281_v4 = vrot.slane %v847_v21, %v818_v14  ;;  %v285_v5 = vrot.slane %v852_v22, %v816_v13 }
  0x15   :  { %v289_v6 = vrot.slane %v852_v22, %v818_v14  ;;  %v935_v7 = vrot.slane %v229_v55, %v816_v13  ;;  %v938_v8 = vrot.slane %v233_v56, %v816_v13  ;;  %v941_v9 = vrot.slane %v237_v57, %v816_v13 }
  0x16   :  { %v944_v10 = vrot.slane %v241_v58, %v816_v13  ;;  %v947_v23 = vrot.slane %v245_v59, %v816_v13  ;;  %v950_v24 = vrot.slane %v249_v60, %v816_v13  ;;  %v953_v14 = vrot.slane %v253_v61, %v816_v13 }
  0x17   :  { %1368 = vst [vmem:[#allocation18_spill] sm:$0xff] %v935_v7  ;;  %1369 = vst [vmem:[#allocation19_spill] sm:$0xff] %v938_v8  ;;  %v956_v25 = vrot.slane %v257_v62, %v816_v13  ;;  %v959_v26 = vrot.slane %v261_v63, %v816_v13  ;;  %v962_v27 = vrot.slane %v265_v0, %v816_v13 }
  0x18   :  { %1370 = vst [vmem:[#allocation20_spill] sm:$0xff] %v941_v9  ;;  %1371 = vst [vmem:[#allocation21_spill] sm:$0xff] %v944_v10  ;;  %v965_v28 = vrot.slane %v269_v1, %v816_v13  ;;  %v968_v29 = vrot.slane %v273_v2, %v816_v13  ;;  %v971_v30 = vrot.slane %v277_v3, %v816_v13 }
  0x19   :  { %1372 = vst [vmem:[#allocation22_spill] sm:$0xff] %v947_v23  ;;  %1373 = vst [vmem:[#allocation23_spill] sm:$0xff] %v950_v24  ;;  %v974_v31 = vrot.slane %v281_v4, %v816_v13  ;;  %v977_v32 = vrot.slane %v285_v5, %v816_v13  ;;  %v980_v33 = vrot.slane %v289_v6, %v816_v13 }
  0x1a   :  { %1374 = vst [vmem:[#allocation24_spill] sm:$0xff] %v953_v14  ;;  %1375 = vst [vmem:[#allocation25_spill] sm:$0xff] %v956_v25  ;;  %v445_v34 = vrot.slane %v809_v11, %v830_v17  ;;  %v449_v35 = vrot.slane %v809_v11, %v832_v18  ;;  %v453_v36 = vrot.slane %v814_v12, %v830_v17 }
  0x1b   :  { %1376 = vst [vmem:[#allocation26_spill] sm:$0xff] %v959_v26  ;;  %1377 = vst [vmem:[#allocation27_spill] sm:$0xff] %v962_v27  ;;  %v457_v37 = vrot.slane %v814_v12, %v832_v18  ;;  %v461_v38 = vrot.slane %v823_v15, %v830_v17  ;;  %v465_v55 = vrot.slane %v823_v15, %v832_v18 }
  0x1c   :  { %1378 = vst [vmem:[#allocation28_spill] sm:$0xff] %v965_v28  ;;  %1379 = vst [vmem:[#allocation29_spill] sm:$0xff] %v968_v29  ;;  %v469_v13 = vrot.slane %v828_v16, %v830_v17  ;;  %v473_v56 = vrot.slane %v828_v16, %v832_v18  ;;  %v477_v11 = vrot.slane %v837_v19, %v830_v17 }
  0x1d   :  { %1380 = vst [vmem:[#allocation30_spill] sm:$0xff] %v971_v30  ;;  %1381 = vst [vmem:[#allocation31_spill] sm:$0xff] %v974_v31  ;;  %v481_v57 = vrot.slane %v837_v19, %v832_v18  ;;  %v485_v12 = vrot.slane %v842_v20, %v830_v17  ;;  %v489_v58 = vrot.slane %v842_v20, %v832_v18 }
  0x1e   :  { %1382 = vst [vmem:[#allocation32_spill] sm:$0xff] %v977_v32  ;;  %v493_v15 = vrot.slane %v847_v21, %v830_v17  ;;  %v497_v59 = vrot.slane %v847_v21, %v832_v18  ;;  %v501_v16 = vrot.slane %v852_v22, %v830_v17  ;;  %v505_v60 = vrot.slane %v852_v22, %v832_v18 }
  0x1f   :  { %v1015_v19 = vrot.slane %v445_v34, %v830_v17  ;;  %v1018_v61 = vrot.slane %v449_v35, %v830_v17  ;;  %v1021_v20 = vrot.slane %v453_v36, %v830_v17  ;;  %v1024_v62 = vrot.slane %v457_v37, %v830_v17 }
  0x20   :  { %v1027_v21 = vrot.slane %v461_v38, %v830_v17  ;;  %v1030_v63 = vrot.slane %v465_v55, %v830_v17  ;;  %v1033_v18 = vrot.slane %v469_v13, %v830_v17  ;;  %v1036_v22 = vrot.slane %v473_v56, %v830_v17 }
  0x21   :  { %v1039_v0 = vrot.slane %v477_v11, %v830_v17  ;;  %v1042_v1 = vrot.slane %v481_v57, %v830_v17  ;;  %v1045_v2 = vrot.slane %v485_v12, %v830_v17  ;;  %v1048_v3 = vrot.slane %v489_v58, %v830_v17 }
  0x22   :  { %v1051_v6 = vrot.slane %v493_v15, %v830_v17  ;;  %v1054_v34 = vrot.slane %v497_v59, %v830_v17  ;;  %v1057_v35 = vrot.slane %v501_v16, %v830_v17  ;;  %v1060_v36 = vrot.slane %v505_v60, %v830_v17 }
  0x23   :  { %1383 = vst [vmem:[#allocation33_spill] sm:$0xff] %v1042_v1  ;;  %1384 = vst [vmem:[#allocation34_spill] sm:$0xff] %v1045_v2 }
  0x24   :  { %1385 = vst [vmem:[#allocation35_spill] sm:$0xff] %v1048_v3  ;;  %1386 = vst [vmem:[#allocation36_spill] sm:$0xff] %v1051_v6 }
  0x25   :  { %1387 = vst [vmem:[#allocation37_spill] sm:$0xff] %v1054_v34  ;;  %1388 = vst [vmem:[#allocation38_spill] sm:$0xff] %v1057_v35 }
  0x26   :  { %1389 = vst [vmem:[#allocation39_spill] sm:$0xff] %v1060_v36 }
  0x81   :  { %v220_v4 = vpop.permute.xlu1 %219  ;;  %v27_v5 = vpop.permute.xlu0 %26 }
  0x82   :  { %v186_v37 = vmul.f32 %v870_v39, %v27_v5  ;;  %v187_v38 = vmul.f32 %v872_v40, %v27_v5  ;;  %v188_v55 = vmul.f32 %v874_v41, %v27_v5  ;;  %v189_v13 = vmul.f32 %v876_v42, %v27_v5 }
  0x83   :  { %v190_v56 = vmul.f32 %v878_v43, %v27_v5  ;;  %v191_v11 = vmul.f32 %v880_v44, %v27_v5  ;;  %v192_v57 = vmul.f32 %v882_v45, %v27_v5  ;;  %v193_v12 = vmul.f32 %v884_v46, %v27_v5 }
  0x84   :  { %v202_v58 = vmul.f32 %v886_v47, %v27_v5  ;;  %v203_v17 = vmul.f32 %v888_v48, %v27_v5  ;;  %v204_v15 = vmul.f32 %v890_v49, %v27_v5  ;;  %v205_v59 = vmul.f32 %v892_v50, %v27_v5 }
  0x85   :  { %v1074_v16 = vpop.permute.xlu0 %31  ;;  %v206_v60 = vmul.f32 %v894_v51, %v27_v5  ;;  %v207_v43 = vmul.f32 %v896_v52, %v27_v5  ;;  %v208_v44 = vmul.f32 %v898_v53, %v27_v5  ;;  %v209_v45 = vmul.f32 %v900_v54, %v27_v5  ;;  %v1084_v42 = vpop.permute.xlu1 %223 }
  0x86   :  { %1390 = vst [vmem:[#allocation40_spill] sm:$0xff] %v1074_v16  ;;  %v370_v46 = vmul.f32 %v935_v7, %v220_v4  ;;  %v371_v47 = vmul.f32 %v938_v8, %v220_v4  ;;  %v372_v48 = vmul.f32 %v941_v9, %v220_v4  ;;  %v373_v49 = vmul.f32 %v944_v10, %v220_v4 }
  0x87   :  { %1391 = vst [vmem:[#allocation41_spill] sm:$0xff] %v1084_v42  ;;  %v374_v50 = vmul.f32 %v947_v23, %v220_v4  ;;  %v375_v51 = vmul.f32 %v950_v24, %v220_v4  ;;  %v376_v52 = vmul.f32 %v953_v14, %v220_v4  ;;  %v377_v53 = vmul.f32 %v956_v25, %v220_v4 }
  0x88   :  { %v386_v5 = vmul.f32 %v959_v26, %v220_v4  ;;  %v387_v7 = vmul.f32 %v962_v27, %v220_v4  ;;  %v388_v8 = vmul.f32 %v965_v28, %v220_v4  ;;  %v389_v9 = vmul.f32 %v968_v29, %v220_v4 }
  0x89   :  { %v390_v10 = vmul.f32 %v971_v30, %v220_v4  ;;  %v391_v42 = vmul.f32 %v974_v31, %v220_v4  ;;  %v392_v23 = vmul.f32 %v977_v32, %v220_v4  ;;  %v393_v24 = vmul.f32 %v980_v33, %v220_v4  ;;  %v1395_v4 = vld [vmem:[#allocation39_spill] sm:$0xff] }
  0x8a   :  { %v402_v54 = vadd.f32 %v370_v46, %v186_v37  ;;  %v403_v14 = vadd.f32 %v371_v47, %v187_v38  ;;  %v404_v41 = vadd.f32 %v372_v48, %v188_v55  ;;  %v405_v25 = vadd.f32 %v373_v49, %v189_v13  ;;  %v436_v40 = vpop.permute.xlu0 %435  ;;  %v1098_v30 = vpop.permute.xlu1 %439 }
  0x8b   :  { %v406_v26 = vadd.f32 %v374_v50, %v190_v56  ;;  %v407_v39 = vadd.f32 %v375_v51, %v191_v11  ;;  %v408_v27 = vadd.f32 %v376_v52, %v192_v57  ;;  %v409_v16 = vadd.f32 %v377_v53, %v193_v12 }
  0x8c   :  { %v418_v28 = vadd.f32 %v386_v5, %v202_v58  ;;  %v419_v36 = vadd.f32 %v387_v7, %v203_v17  ;;  %v420_v29 = vadd.f32 %v388_v8, %v204_v15  ;;  %v421_v35 = vadd.f32 %v389_v9, %v205_v59  ;;  %v1392_v7 = vld [vmem:[#allocation36_spill] sm:$0xff]  ;;  %v1393_v9 = vld [vmem:[#allocation37_spill] sm:$0xff] }
  0x8d   :  { %v422_v31 = vadd.f32 %v390_v10, %v206_v60  ;;  %v423_v34 = vadd.f32 %v391_v42, %v207_v43  ;;  %v424_v32 = vadd.f32 %v392_v23, %v208_v44  ;;  %v425_v6 = vadd.f32 %v393_v24, %v209_v45  ;;  %v1394_v23 = vld [vmem:[#allocation38_spill] sm:$0xff] }
  0x8e   :  { %v586_v46 = vmul.f32 %v1015_v19, %v436_v40  ;;  %v587_v47 = vmul.f32 %v1018_v61, %v436_v40  ;;  %v588_v48 = vmul.f32 %v1021_v20, %v436_v40  ;;  %v589_v49 = vmul.f32 %v1024_v62, %v436_v40 }
  0x8f   :  { %v590_v50 = vmul.f32 %v1027_v21, %v436_v40  ;;  %v591_v51 = vmul.f32 %v1030_v63, %v436_v40  ;;  %v592_v52 = vmul.f32 %v1033_v18, %v436_v40  ;;  %v593_v53 = vmul.f32 %v1036_v22, %v436_v40  ;;  %v655_v11 = vpop.permute.xlu1 %654 }
  0x90   :  { %v602_v42 = vmul.f32 %v1039_v0, %v436_v40  ;;  %v603_v43 = vmul.f32 %v1042_v1, %v436_v40  ;;  %v604_v44 = vmul.f32 %v1045_v2, %v436_v40  ;;  %v605_v45 = vmul.f32 %v1048_v3, %v436_v40 }
  0x91   :  { %v606_v8 = vmul.f32 %v1392_v7, %v436_v40  ;;  %v607_v10 = vmul.f32 %v1393_v9, %v436_v40  ;;  %v608_v24 = vmul.f32 %v1394_v23, %v436_v40  ;;  %v609_v37 = vmul.f32 %v1395_v4, %v436_v40 }
  0x92   :  { %v618_v38 = vadd.f32 %v586_v46, %v402_v54  ;;  %v619_v55 = vadd.f32 %v587_v47, %v403_v14  ;;  %v620_v13 = vadd.f32 %v588_v48, %v404_v41  ;;  %v621_v56 = vadd.f32 %v589_v49, %v405_v25 }
  0x93   :  { %v622_v57 = vadd.f32 %v590_v50, %v406_v26  ;;  %v623_v12 = vadd.f32 %v591_v51, %v407_v39  ;;  %v624_v58 = vadd.f32 %v592_v52, %v408_v27  ;;  %v625_v17 = vadd.f32 %v593_v53, %v409_v16 }
  0x94   :  { %v634_v15 = vadd.f32 %v602_v42, %v418_v28  ;;  %v635_v59 = vadd.f32 %v603_v43, %v419_v36  ;;  %v636_v60 = vadd.f32 %v604_v44, %v420_v29  ;;  %v637_v5 = vadd.f32 %v605_v45, %v421_v35  ;;  %v1396_v44 = vld [vmem:[#allocation40_spill] sm:$0xff]  ;;  %v1397_v45 = vld [vmem:[#allocation2_spill] sm:$0xff] }
  0x95   :  { %v638_v7 = vadd.f32 %v606_v8, %v422_v31  ;;  %v639_v3 = vadd.f32 %v607_v10, %v423_v34  ;;  %v640_v9 = vadd.f32 %v608_v24, %v424_v32  ;;  %v641_v2 = vadd.f32 %v609_v37, %v425_v6  ;;  %v1398_v8 = vld [vmem:[#allocation3_spill] sm:$0xff]  ;;  %v1399_v10 = vld [vmem:[#allocation4_spill] sm:$0xff]  ;;  %v1400_v24 = vld [vmem:[#allocation5_spill] sm:$0xff] }
  0x96   :  { %v662_v23 = vadd.f32 %v655_v11, %v618_v38  ;;  %v663_v1 = vadd.f32 %v655_v11, %v619_v55  ;;  %v664_v40 = vadd.f32 %v655_v11, %v620_v13  ;;  %v665_v54 = vadd.f32 %v655_v11, %v621_v56  ;;  %v1401_v38 = vld [vmem:[#allocation6_spill] sm:$0xff]  ;;  %v1402_v13 = vld [vmem:[#allocation7_spill] sm:$0xff] }
  0x97   :  { %v666_v14 = vadd.f32 %v655_v11, %v622_v57  ;;  %v667_v41 = vadd.f32 %v655_v11, %v623_v12  ;;  %v668_v25 = vadd.f32 %v655_v11, %v624_v58  ;;  %v669_v46 = vadd.f32 %v655_v11, %v625_v17  ;;  %v1404_v12 = vld [vmem:[#allocation9_spill] sm:$0xff]  ;;  %v1405_v17 = vld [vmem:[#allocation10_spill] sm:$0xff] }
  0x98   :  { %v678_v26 = vadd.f32 %v655_v11, %v634_v15  ;;  %v679_v39 = vadd.f32 %v655_v11, %v635_v59  ;;  %v680_v27 = vadd.f32 %v655_v11, %v636_v60  ;;  %v681_v16 = vadd.f32 %v655_v11, %v637_v5  ;;  %v1406_v59 = vld [vmem:[#allocation11_spill] sm:$0xff]  ;;  %v1407_v5 = vld [vmem:[#allocation12_spill] sm:$0xff] }
  0x99   :  { %v682_v28 = vadd.f32 %v655_v11, %v638_v7  ;;  %v683_v36 = vadd.f32 %v655_v11, %v639_v3  ;;  %v684_v29 = vadd.f32 %v655_v11, %v640_v9  ;;  %v685_v35 = vadd.f32 %v655_v11, %v641_v2  ;;  %v1403_v11 = vld [vmem:[#allocation8_spill] sm:$0xff] }
  0x9a   :  { %v694_v31 = vmax.f32 %v662_v23, 0.0  ;;  %v695_v34 = vmax.f32 %v663_v1, 0.0  ;;  %v696_v32 = vmax.f32 %v664_v40, 0.0  ;;  %v697_v6 = vmax.f32 %v665_v54, 0.0  ;;  %v1408_v54 = vld [vmem:[#allocation13_spill] sm:$0xff] }
  0x9b   :  { %v698_v47 = vmax.f32 %v666_v14, 0.0  ;;  %v699_v48 = vmax.f32 %v667_v41, 0.0  ;;  %v700_v49 = vmax.f32 %v668_v25, 0.0  ;;  %v701_v50 = vmax.f32 %v669_v46, 0.0  ;;  %v1409_v41 = vld [vmem:[#allocation14_spill] sm:$0xff]  ;;  %v1410_v46 = vld [vmem:[#allocation15_spill] sm:$0xff] }
  0x9c   :  { %v710_v51 = vmax.f32 %v678_v26, 0.0  ;;  %v711_v52 = vmax.f32 %v679_v39, 0.0  ;;  %v712_v53 = vmax.f32 %v680_v27, 0.0  ;;  %v713_v42 = vmax.f32 %v681_v16, 0.0  ;;  %726 = vst [vmem:[%s1311_s3] sm:$0xff] %v694_v31  ;;  %727 = vst [vmem:[%s1311_s3 + $0x8] sm:$0xff] %v695_v34  ;;  %v1411_v39 = vld [vmem:[#allocation16_spill] sm:$0xff] }
  0x9d   :  { %728 = vst [vmem:[%s1311_s3 + $0x10] sm:$0xff] %v696_v32  ;;  %729 = vst [vmem:[%s1311_s3 + $0x18] sm:$0xff] %v697_v6  ;;  %v714_v1 = vmax.f32 %v682_v28, 0.0  ;;  %v715_v2 = vmax.f32 %v683_v36, 0.0  ;;  %v716_v3 = vmax.f32 %v684_v29, 0.0  ;;  %v717_v43 = vmax.f32 %v685_v35, 0.0 }
  0x9e   :  { %730 = vst [vmem:[%s1311_s3 + $0x20] sm:$0xff] %v698_v47  ;;  %731 = vst [vmem:[%s1311_s3 + $0x28] sm:$0xff] %v699_v48  ;;  %v194_v7 = vmul.f32 %v1397_v45, %v1396_v44  ;;  %v195_v9 = vmul.f32 %v1398_v8, %v1396_v44  ;;  %v196_v23 = vmul.f32 %v1399_v10, %v1396_v44  ;;  %v1412_v16 = vld [vmem:[#allocation17_spill] sm:$0xff]  ;;  %v1414_v29 = vld [vmem:[#allocation18_spill] sm:$0xff] }
  0x9f   :  { %732 = vst [vmem:[%s1311_s3 + $0x30] sm:$0xff] %v700_v49  ;;  %733 = vst [vmem:[%s1311_s3 + $0x38] sm:$0xff] %v701_v50  ;;  %v197_v37 = vmul.f32 %v1400_v24, %v1396_v44  ;;  %v198_v55 = vmul.f32 %v1401_v38, %v1396_v44  ;;  %v199_v56 = vmul.f32 %v1402_v13, %v1396_v44  ;;  %v1413_v36 = vld [vmem:[#allocation41_spill] sm:$0xff]  ;;  %v1415_v31 = vld [vmem:[#allocation19_spill] sm:$0xff] }
  0xa0   :  { %742 = vst [vmem:[%s1311_s3 + $0x80] sm:$0xff] %v710_v51  ;;  %743 = vst [vmem:[%s1311_s3 + $0x88] sm:$0xff] %v711_v52  ;;  %v200_v57 = vmul.f32 %v1403_v11, %v1396_v44  ;;  %v201_v58 = vmul.f32 %v1404_v12, %v1396_v44  ;;  %v210_v15 = vmul.f32 %v1405_v17, %v1396_v44  ;;  %v1416_v32 = vld [vmem:[#allocation20_spill] sm:$0xff]  ;;  %v1417_v47 = vld [vmem:[#allocation21_spill] sm:$0xff] }
  0xa1   :  { %744 = vst [vmem:[%s1311_s3 + $0x90] sm:$0xff] %v712_v53  ;;  %745 = vst [vmem:[%s1311_s3 + $0x98] sm:$0xff] %v713_v42  ;;  %v211_v60 = vmul.f32 %v1406_v59, %v1396_v44  ;;  %v212_v40 = vmul.f32 %v1407_v5, %v1396_v44  ;;  %v213_v14 = vmul.f32 %v1408_v54, %v1396_v44  ;;  %v1418_v49 = vld [vmem:[#allocation22_spill] sm:$0xff]  ;;  %v1419_v51 = vld [vmem:[#allocation23_spill] sm:$0xff] }
  0xa2   :  { %746 = vst [vmem:[%s1311_s3 + $0xa0] sm:$0xff] %v714_v1  ;;  %747 = vst [vmem:[%s1311_s3 + $0xa8] sm:$0xff] %v715_v2  ;;  %v214_v25 = vmul.f32 %v1409_v41, %v1396_v44  ;;  %v215_v26 = vmul.f32 %v1410_v46, %v1396_v44  ;;  %v216_v27 = vmul.f32 %v1411_v39, %v1396_v44  ;;  %v1420_v53 = vld [vmem:[#allocation24_spill] sm:$0xff]  ;;  %v1421_v1 = vld [vmem:[#allocation25_spill] sm:$0xff] }
  0xa3   :  { %748 = vst [vmem:[%s1311_s3 + $0xb0] sm:$0xff] %v716_v3  ;;  %749 = vst [vmem:[%s1311_s3 + $0xb8] sm:$0xff] %v717_v43  ;;  %v217_v28 = vmul.f32 %v1412_v16, %v1396_v44  ;;  %v378_v35 = vmul.f32 %v1414_v29, %v1413_v36  ;;  %v379_v34 = vmul.f32 %v1415_v31, %v1413_v36  ;;  %v1422_v3 = vld [vmem:[#allocation26_spill] sm:$0xff]  ;;  %v1423_v44 = vld [vmem:[#allocation27_spill] sm:$0xff] }
  0xa4   :  { %v380_v6 = vmul.f32 %v1416_v32, %v1413_v36  ;;  %v381_v48 = vmul.f32 %v1417_v47, %v1413_v36  ;;  %v382_v50 = vmul.f32 %v1418_v49, %v1413_v36  ;;  %v383_v52 = vmul.f32 %v1419_v51, %v1413_v36  ;;  %v1424_v8 = vld [vmem:[#allocation28_spill] sm:$0xff]  ;;  %v1425_v24 = vld [vmem:[#allocation29_spill] sm:$0xff]  ;;  %v1426_v13 = vld [vmem:[#allocation30_spill] sm:$0xff] }
  0xa5   :  { %v384_v42 = vmul.f32 %v1420_v53, %v1413_v36  ;;  %v385_v2 = vmul.f32 %v1421_v1, %v1413_v36  ;;  %v394_v43 = vmul.f32 %v1422_v3, %v1413_v36  ;;  %v395_v45 = vmul.f32 %v1423_v44, %v1413_v36  ;;  %v1427_v12 = vld [vmem:[#allocation31_spill] sm:$0xff]  ;;  %v1428_v59 = vld [vmem:[#allocation32_spill] sm:$0xff] }
  0xa6   :  { %v396_v10 = vmul.f32 %v1424_v8, %v1413_v36  ;;  %v397_v38 = vmul.f32 %v1425_v24, %v1413_v36  ;;  %v398_v11 = vmul.f32 %v1426_v13, %v1413_v36  ;;  %v399_v17 = vmul.f32 %v1427_v12, %v1413_v36 }
  0xa7   :  { %v400_v5 = vmul.f32 %v1428_v59, %v1413_v36  ;;  %v401_v54 = vmul.f32 %v980_v33, %v1413_v36  ;;  %v410_v41 = vadd.f32 %v378_v35, %v194_v7  ;;  %v411_v46 = vadd.f32 %v379_v34, %v195_v9 }
  0xa8   :  { %v412_v39 = vadd.f32 %v380_v6, %v196_v23  ;;  %v413_v16 = vadd.f32 %v381_v48, %v197_v37  ;;  %v414_v29 = vadd.f32 %v382_v50, %v198_v55  ;;  %v415_v31 = vadd.f32 %v383_v52, %v199_v56 }
  0xa9   :  { %v416_v32 = vadd.f32 %v384_v42, %v200_v57  ;;  %v417_v47 = vadd.f32 %v385_v2, %v201_v58  ;;  %v426_v49 = vadd.f32 %v394_v43, %v210_v15  ;;  %v427_v51 = vadd.f32 %v395_v45, %v211_v60 }
  0xaa   :  { %v428_v53 = vadd.f32 %v396_v10, %v212_v40  ;;  %v429_v1 = vadd.f32 %v397_v38, %v213_v14  ;;  %v430_v3 = vadd.f32 %v398_v11, %v214_v25  ;;  %v431_v44 = vadd.f32 %v399_v17, %v215_v26 }
  0xab   :  { %v432_v8 = vadd.f32 %v400_v5, %v216_v27  ;;  %v433_v24 = vadd.f32 %v401_v54, %v217_v28  ;;  %v594_v13 = vmul.f32 %v1015_v19, %v1098_v30  ;;  %v595_v33 = vmul.f32 %v1018_v61, %v1098_v30  ;;  %v660_v28 = vpop.permute.xlu0 %659 }
  0xac   :  { %v596_v7 = vmul.f32 %v1021_v20, %v1098_v30  ;;  %v597_v9 = vmul.f32 %v1024_v62, %v1098_v30  ;;  %v598_v23 = vmul.f32 %v1027_v21, %v1098_v30  ;;  %v599_v37 = vmul.f32 %v1030_v63, %v1098_v30  ;;  %v1429_v20 = vld [vmem:[#allocation33_spill] sm:$0xff]  ;;  %v1430_v62 = vld [vmem:[#allocation34_spill] sm:$0xff]  ;;  %v1431_v21 = vld [vmem:[#allocation35_spill] sm:$0xff] }
  0xad   :  { %v600_v55 = vmul.f32 %v1033_v18, %v1098_v30  ;;  %v601_v19 = vmul.f32 %v1036_v22, %v1098_v30  ;;  %v610_v61 = vmul.f32 %v1039_v0, %v1098_v30  ;;  %v611_v56 = vmul.f32 %v1429_v20, %v1098_v30  ;;  %v1432_v63 = vld [vmem:[#allocation36_spill] sm:$0xff]  ;;  %v1433_v18 = vld [vmem:[#allocation37_spill] sm:$0xff]  ;;  %v1434_v22 = vld [vmem:[#allocation38_spill] sm:$0xff] }
  0xae   :  { %v612_v57 = vmul.f32 %v1430_v62, %v1098_v30  ;;  %v613_v58 = vmul.f32 %v1431_v21, %v1098_v30  ;;  %v614_v15 = vmul.f32 %v1432_v63, %v1098_v30  ;;  %v615_v60 = vmul.f32 %v1433_v18, %v1098_v30 }
  0xaf   :  { %v616_v40 = vmul.f32 %v1434_v22, %v1098_v30  ;;  %v617_v0 = vmul.f32 %v1395_v4, %v1098_v30  ;;  %v626_v14 = vadd.f32 %v594_v13, %v410_v41  ;;  %v627_v25 = vadd.f32 %v595_v33, %v411_v46 }
  0xb0   :  { %v628_v26 = vadd.f32 %v596_v7, %v412_v39  ;;  %v629_v27 = vadd.f32 %v597_v9, %v413_v16  ;;  %v630_v36 = vadd.f32 %v598_v23, %v414_v29  ;;  %v631_v35 = vadd.f32 %v599_v37, %v415_v31 }
  0xb1   :  { %v632_v34 = vadd.f32 %v600_v55, %v416_v32  ;;  %v633_v6 = vadd.f32 %v601_v19, %v417_v47  ;;  %v642_v48 = vadd.f32 %v610_v61, %v426_v49  ;;  %v643_v50 = vadd.f32 %v611_v56, %v427_v51 }
  0xb2   :  { %v644_v52 = vadd.f32 %v612_v57, %v428_v53  ;;  %v645_v42 = vadd.f32 %v613_v58, %v429_v1  ;;  %v646_v2 = vadd.f32 %v614_v15, %v430_v3  ;;  %v647_v43 = vadd.f32 %v615_v60, %v431_v44 }
  0xb3   :  { %v648_v45 = vadd.f32 %v616_v40, %v432_v8  ;;  %v649_v10 = vadd.f32 %v617_v0, %v433_v24  ;;  %v670_v38 = vadd.f32 %v660_v28, %v626_v14  ;;  %v671_v11 = vadd.f32 %v660_v28, %v627_v25 }
  0xb4   :  { %v672_v30 = vadd.f32 %v660_v28, %v628_v26  ;;  %v673_v4 = vadd.f32 %v660_v28, %v629_v27  ;;  %v674_v12 = vadd.f32 %v660_v28, %v630_v36  ;;  %v675_v17 = vadd.f32 %v660_v28, %v631_v35 }
  0xb5   :  { %v676_v59 = vadd.f32 %v660_v28, %v632_v34  ;;  %v677_v5 = vadd.f32 %v660_v28, %v633_v6  ;;  %v686_v54 = vadd.f32 %v660_v28, %v642_v48  ;;  %v687_v41 = vadd.f32 %v660_v28, %v643_v50 }
  0xb6   :  { %v688_v46 = vadd.f32 %v660_v28, %v644_v52  ;;  %v689_v39 = vadd.f32 %v660_v28, %v645_v42  ;;  %v690_v16 = vadd.f32 %v660_v28, %v646_v2  ;;  %v691_v29 = vadd.f32 %v660_v28, %v647_v43 }
  0xb7   :  { %v692_v31 = vadd.f32 %v660_v28, %v648_v45  ;;  %v693_v32 = vadd.f32 %v660_v28, %v649_v10  ;;  %v702_v47 = vmax.f32 %v670_v38, 0.0  ;;  %v703_v49 = vmax.f32 %v671_v11, 0.0 }
  0xb8   :  { %v704_v51 = vmax.f32 %v672_v30, 0.0  ;;  %v705_v53 = vmax.f32 %v673_v4, 0.0  ;;  %v706_v1 = vmax.f32 %v674_v12, 0.0  ;;  %v707_v3 = vmax.f32 %v675_v17, 0.0 }
  0xb9   :  { %v708_v44 = vmax.f32 %v676_v59, 0.0  ;;  %v709_v8 = vmax.f32 %v677_v5, 0.0  ;;  %v718_v24 = vmax.f32 %v686_v54, 0.0  ;;  %v719_v13 = vmax.f32 %v687_v41, 0.0  ;;  %734 = vst [vmem:[%s1311_s3 + $0x40] sm:$0x1f] %v702_v47 }
  0xba   :  { %v720_v33 = vmax.f32 %v688_v46, 0.0  ;;  %v721_v7 = vmax.f32 %v689_v39, 0.0  ;;  %735 = vst [vmem:[%s1311_s3 + $0x48] sm:$0x1f] %v703_v49  ;;  %736 = vst [vmem:[%s1311_s3 + $0x50] sm:$0x1f] %v704_v51 }
  0xbb   :  { %737 = vst [vmem:[%s1311_s3 + $0x58] sm:$0x1f] %v705_v53  ;;  %v722_v9 = vmax.f32 %v690_v16, 0.0  ;;  %v723_v23 = vmax.f32 %v691_v29, 0.0  ;;  %v724_v37 = vmax.f32 %v692_v31, 0.0  ;;  %v725_v55 = vmax.f32 %v693_v32, 0.0 }
  0xbc   :  { %738 = vst [vmem:[%s1311_s3 + $0x60] sm:$0x1f] %v706_v1  ;;  %739 = vst [vmem:[%s1311_s3 + $0x68] sm:$0x1f] %v707_v3 }
  0xbd   :  { %740 = vst [vmem:[%s1311_s3 + $0x70] sm:$0x1f] %v708_v44  ;;  %741 = vst [vmem:[%s1311_s3 + $0x78] sm:$0x1f] %v709_v8 }
  0xbe   :  { %750 = vst [vmem:[%s1311_s3 + $0xc0] sm:$0x1f] %v718_v24  ;;  %751 = vst [vmem:[%s1311_s3 + $0xc8] sm:$0x1f] %v719_v13 }
  0xbf   :  { %752 = vst [vmem:[%s1311_s3 + $0xd0] sm:$0x1f] %v720_v33  ;;  %753 = vst [vmem:[%s1311_s3 + $0xd8] sm:$0x1f] %v721_v7 }
  0xc0   :  { %754 = vst [vmem:[%s1311_s3 + $0xe0] sm:$0x1f] %v722_v9  ;;  %755 = vst [vmem:[%s1311_s3 + $0xe8] sm:$0x1f] %v723_v23 }
  0xc1   :  { %756 = vst [vmem:[%s1311_s3 + $0xf0] sm:$0x1f] %v724_v37  ;;  %757 = vst [vmem:[%s1311_s3 + $0xf8] sm:$0x1f] %v725_v55 }

</bundles_post_ra>
